<compile_context>
chip_gen: v7x
topology: tpu7x:2x2x1
jax: 0.10.0
libtpu: 0.0.40
codegen_flags: <defaults>
</compile_context>

<pallas_src>
import jax
import jax.numpy as jnp
from jax.experimental import pallas as pl
from jax.experimental.pallas import tpu as pltpu


def _round_up(x, m):
    return (x + m - 1) // m * m


def _pick_time_tile(*, n_phases, c_in_p, c_out_pad, k, t_out, w_e, out_bytes,
                    budget_bytes, tt_max):
    """Largest time tile (multiple of 128) that keeps the step under budget."""
    t_out_128 = _round_up(max(t_out, 1), 128)
    fixed = (n_phases * c_in_p * (t_out_128 + w_e) * 2 * 2   # resident phase slabs
             + 2 * c_out_pad * k * c_in_p * 2 * 2            # stacked weight (bf16, 2 bufs)
             + 2 * c_out_pad * 4 * 2)                        # bias
    per_tt = (2 * c_out_pad * out_bytes                      # output double-buffer
              + n_phases * c_in_p * 2                        # per-phase window loads
              + k * c_in_p * 2                               # in-VMEM patch (bf16)
              + 3 * c_out_pad * 4)                           # f32 acc + GLU temps
    avail = budget_bytes - fixed
    tt = avail // per_tt if avail > 0 else 128
    tt = int(min(tt, tt_max, t_out_128))
    return max(128, (tt // 128) * 128)


def _make_conv1d_glu_kernel(*, n_phases, taps, c_out_pad, tt, w_e):
    """taps: tuple of (phase_slot, lane_offset) per conv tap, in tap order."""

    def kernel(*refs):
        phase_refs = refs[:n_phases]                 # each (C_in_pad, L_phase)
        w_ref = refs[n_phases]                       # (2*C_out_pad, k*C_in_pad)
        b_ref = refs[n_phases + 1]                   # (2*C_out_pad, 1) f32
        o_ref = refs[n_phases + 2]                   # (C_out_pad, TT)

        ti = pl.program_id(1)
        t0 = pl.multiple_of(ti * tt, tt)

        # One aligned dynamic-window load per phase; per-tap shifts are static
        # value slices (cheap lane rotate) -> no strided / unaligned ref reads.
        wins = [ref_[:, pl.ds(t0, tt + w_e)] for ref_ in phase_refs]

        # im2col in VMEM: stack the k taps on the sublane axis -> one matmul.
        rows = [wins[p][:, off:off + tt] for (p, off) in taps]
        patch = rows[0] if len(rows) == 1 else jnp.concatenate(rows, axis=0)

        acc = jnp.dot(w_ref[...], patch, preferred_element_type=jnp.float32)
        acc = acc + b_ref[...]

        # GLU: value/gate halves live on sublanes -> aligned static split.
        a = acc[:c_out_pad]
        g = acc[c_out_pad:]
        o_ref[...] = (a * jax.nn.sigmoid(g)).astype(o_ref.dtype)

    return kernel


def conv1d_glu(x, t_valid, weight, bias, *, stride=2,
               out_dtype=jnp.bfloat16, compute_dtype=jnp.bfloat16,
               vmem_budget_bytes=24 << 20, tt_max=2048):
    """One strided Conv1d + GLU layer, channels-first.

    x      : (B, C_x, T_x); only x[:, :, :t_valid] is meaningful, channels
             beyond the conv's true in_channels must be zero.
    weight : (2*C_out, C_in, k)   (PyTorch nn.Conv1d layout)
    bias   : (2*C_out,)
    Returns (y, t_out): y is (B, C_out_pad, T_out_pad); y[:, :C_out, :t_out] is
    the real output, padding channels are exact zeros, padding time columns
    are junk and must never be consumed (callers pass t_out along).
    """
    B, C_x, T_x = x.shape
    C2, C_in_true, k = weight.shape
    C_out = C2 // 2
    pad = k // 2
    t_out = (t_valid + 2 * pad - k) // stride + 1
    assert t_out >= 1

    c_in_p = _round_up(max(C_x, C_in_true), 16)
    c_out_pad = _round_up(C_out, 16)

    # Tap geometry: input index for output t, tap j is stride*t + j - pad.
    # Split by phase (index mod stride) so the wrapper materializes only
    # `stride` de-interleaved slabs (~1x activation) instead of k (im2col).
    shifts = [(j - pad) // stride for j in range(k)]
    phase_of = [(j - pad) % stride for j in range(k)]
    s_min = min(shifts)
    offs = [s - s_min for s in shifts]
    off_max = max(offs)
    used_phases = sorted(set(phase_of))
    phase_slot = {ph: i for i, ph in enumerate(used_phases)}
    taps = tuple((phase_slot[phase_of[j]], offs[j]) for j in range(k))
    n_phases = len(used_phases)
    w_e = _round_up(off_max, 128) if off_max else 0

    out_bytes = jnp.dtype(out_dtype).itemsize
    tt = _pick_time_tile(n_phases=n_phases, c_in_p=c_in_p, c_out_pad=c_out_pad,
                         k=k, t_out=t_out, w_e=w_e, out_bytes=out_bytes,
                         budget_bytes=vmem_budget_bytes, tt_max=tt_max)
    t_out_pad = _round_up(t_out, tt)
    n_tt = t_out_pad // tt
    l_ph = t_out_pad + w_e                       # multiple of 128 by construction

    # --- de-interleave the (zero-extended) valid input into phase slabs ------
    x_val = x[:, :, :t_valid]
    if C_x < c_in_p:
        x_val = jnp.pad(x_val, ((0, 0), (0, c_in_p - C_x), (0, 0)))
    lpad = -stride * s_min
    rpad = max(0, stride * l_ph - lpad - t_valid)
    x_ext = jnp.pad(x_val, ((0, 0), (0, 0), (lpad, rpad))).astype(compute_dtype)
    phases = [x_ext[:, :, ph::stride][:, :, :l_ph] for ph in used_phases]

    # --- stack value/gate weight halves into ONE MXU operand -----------------
    w = weight
    if C_in_true < c_in_p:
        w = jnp.pad(w, ((0, 0), (0, c_in_p - C_in_true), (0, 0)))
    w2d = jnp.transpose(w, (0, 2, 1)).reshape(C2, k * c_in_p)
    cpad = ((0, c_out_pad - C_out), (0, 0))
    w_stack = jnp.concatenate(
        [jnp.pad(w2d[:C_out], cpad), jnp.pad(w2d[C_out:], cpad)],
        axis=0).astype(compute_dtype)                     # (2*C_out_pad, k*C_in_pad)
    b_stack = jnp.concatenate(
        [jnp.pad(bias[:C_out], (0, c_out_pad - C_out)),
         jnp.pad(bias[C_out:], (0, c_out_pad - C_out))]
    ).reshape(2 * c_out_pad, 1).astype(jnp.float32)

    # VMEM estimate -> scoped-VMEM limit (headroom under v7x's 64 MiB).
    est = (n_phases * c_in_p * l_ph * 2 * 2
           + 2 * c_out_pad * k * c_in_p * 2 * 2
           + 2 * c_out_pad * 4 * 2
           + tt * (2 * c_out_pad * out_bytes
                   + n_phases * c_in_p * 2
                   + k * c_in_p * 2
                   + 3 * c_out_pad * 4))
    vmem_limit = int(min(max(2 * est, 32 << 20), 56 << 20))

    kernel = _make_conv1d_glu_kernel(n_phases=n_phases, taps=taps,
                                     c_out_pad=c_out_pad, tt=tt, w_e=w_e)

    in_specs = [pl.BlockSpec((None, c_in_p, l_ph), lambda bi, ti: (bi, 0, 0))
                for _ in range(n_phases)]
    in_specs += [pl.BlockSpec((2 * c_out_pad, k * c_in_p), lambda bi, ti: (0, 0)),
                 pl.BlockSpec((2 * c_out_pad, 1), lambda bi, ti: (0, 0))]

    y = pl.pallas_call(
        kernel,
        out_shape=jax.ShapeDtypeStruct((B, c_out_pad, t_out_pad), out_dtype),
        grid=(B, n_tt),        # time-tile innermost: phase slabs stay resident
        in_specs=in_specs,
        out_specs=pl.BlockSpec((None, c_out_pad, tt), lambda bi, ti: (bi, 0, ti)),
        compiler_params=pltpu.CompilerParams(
            dimension_semantics=("parallel", "parallel"),
            vmem_limit_bytes=vmem_limit),
    )(*phases, w_stack, b_stack)
    return y, t_out


class Conv1dSubsampler:
    """JAX/Pallas port of the PyTorch Conv1dSubsampler (deterministic init)."""

    def __init__(self, in_channels, mid_channels, out_channels,
                 kernel_sizes=(3, 3), key=jax.random.PRNGKey(0)):
        self.n_layers = len(kernel_sizes)
        self.out_channels = out_channels
        self.weights, self.biases = [], []
        keys = jax.random.split(key, 2 * self.n_layers)
        for i, k in enumerate(kernel_sizes):
            c_in = in_channels if i == 0 else mid_channels // 2
            c_out2 = mid_channels if i < self.n_layers - 1 else out_channels * 2
            bound = 1.0 / (c_in * k) ** 0.5   # PyTorch default Conv1d init range
            w = jax.random.uniform(keys[2 * i], (c_out2, c_in, k),
                                   jnp.float32, -bound, bound)
            b = jax.random.uniform(keys[2 * i + 1], (c_out2,),
                                   jnp.float32, -bound, bound)
            self.weights.append(w)
            self.biases.append(b)

    def get_out_seq_lens(self, in_seq_lens):
        out = in_seq_lens
        for _ in range(self.n_layers):
            out = jnp.floor((out.astype(jnp.float32) - 1) / 2 + 1).astype(jnp.int32)
        return out

    def __call__(self, src_tokens, src_lengths):
        # src_tokens: (B, T, C_in) -> channels-first, like PyTorch's transpose(1,2)
        x = jnp.transpose(src_tokens, (0, 2, 1))           # (B, C_in, T)
        t_valid = x.shape[-1]
        for i, (w, b) in enumerate(zip(self.weights, self.biases)):
            last = i == self.n_layers - 1
            x, t_valid = conv1d_glu(
                x, t_valid, w, b, stride=2,
                out_dtype=jnp.float32 if last else jnp.bfloat16)
        # Single slice (channels + time) after the last layer, then transpose.
        x = x[:, :self.out_channels, :t_valid]
        x = jnp.transpose(x, (2, 0, 1))                     # (T_out, B, C_out)
        return x, self.get_out_seq_lens(src_lengths)


def _reference_forward(model, src_tokens, src_lengths):
    """Pure-JAX (XLA conv) reference with the same bf16 casting policy."""
    x = jnp.transpose(src_tokens, (0, 2, 1))                # (B, C, T)
    n = model.n_layers
    for i, (w, b) in enumerate(zip(model.weights, model.biases)):
        k = w.shape[-1]
        y = jax.lax.conv_general_dilated(
            x.astype(jnp.bfloat16), w.astype(jnp.bfloat16),
            window_strides=(2,), padding=[(k // 2, k // 2)],
            dimension_numbers=("NCH", "OIH", "NCH"),
            preferred_element_type=jnp.float32)
        y = y + b[None, :, None].astype(jnp.float32)
        c = y.shape[1] // 2
        x = y[:, :c, :] * jax.nn.sigmoid(y[:, c:, :])
        x = x.astype(jnp.float32 if i == n - 1 else jnp.bfloat16)
    x = jnp.transpose(x, (2, 0, 1))                          # (T_out, B, C_out)
    return x, model.get_out_seq_lens(src_lengths)


if __name__ == "__main__":
    key = jax.random.PRNGKey(0)
    k_model, k_x = jax.random.split(key)

    B, T_in, in_channels = 2, 16, 16
    mid_channels, out_channels = 32, 16

    model = Conv1dSubsampler(in_channels, mid_channels, out_channels,
                             kernel_sizes=(3, 3), key=k_model)

    src_tokens = jax.random.normal(k_x, (B, T_in, in_channels), jnp.float32)
    src_lengths = jnp.array([16, 12], dtype=jnp.int32)

    out, out_lens = model(src_tokens, src_lengths)
    out = jax.block_until_ready(out)
    out_lens = jax.block_until_ready(out_lens)

    ref_out, ref_lens = _reference_forward(model, src_tokens, src_lengths)
    assert out.shape == ref_out.shape, (out.shape, ref_out.shape)
    max_err = float(jnp.max(jnp.abs(out - ref_out)))
    assert jnp.allclose(out, ref_out, atol=2e-2, rtol=2e-2), max_err
    assert jnp.array_equal(out_lens, ref_lens)

    print("KERNEL_OK")
</pallas_src>

<mosaic_0001>
module attributes {stable_mosaic.version = 11 : i64} {
  func.func @kernel(%arg0: i32, %arg1: i32, %arg2: memref<1x16x256xbf16, #tpu.memory_space<vmem>>, %arg3: memref<1x16x256xbf16, #tpu.memory_space<vmem>>, %arg4: memref<32x48xbf16, #tpu.memory_space<vmem>>, %arg5: memref<32x1xf32, #tpu.memory_space<vmem>>, %arg6: memref<1x16x128xbf16, #tpu.memory_space<vmem>>) attributes {dimension_semantics = [#tpu.dimension_semantics<parallel>, #tpu.dimension_semantics<parallel>], iteration_bounds = array<i64: 2, 1>, scalar_prefetch = 0 : i64, scratch_operands = 0 : i64, tpu.core_type = #tpu.core_type<tc>, window_params = [{transform_indices = @transform_0, window_bounds = array<i64: 1, 16, 256>}, {transform_indices = @transform_1, window_bounds = array<i64: 1, 16, 256>}, {pipeline_mode = #tpu.pipeline_mode<synchronous>, transform_indices = @transform_2, window_bounds = array<i64: 32, 48>}, {pipeline_mode = #tpu.pipeline_mode<synchronous>, transform_indices = @transform_3, window_bounds = array<i64: 32, 1>}, {transform_indices = @transform_4, window_bounds = array<i64: 1, 16, 128>}]} {
    %c128_i32 = arith.constant 128 : i32
    %0 = arith.muli %arg1, %c128_i32 : i32
    %1 = tpu.assume_multiple %0, 128 : i32
    %c0 = arith.constant 0 : index
    %c0_0 = arith.constant 0 : index
    %2 = arith.index_cast %1 : i32 to index
    %3 = vector.load %arg2[%c0, %c0_0, %2] : memref<1x16x256xbf16, #tpu.memory_space<vmem>>, vector<1x16x256xbf16>
    %4 = vector.shape_cast %3 : vector<1x16x256xbf16> to vector<16x256xbf16>
    %c0_1 = arith.constant 0 : index
    %c0_2 = arith.constant 0 : index
    %5 = arith.index_cast %1 : i32 to index
    %6 = vector.load %arg3[%c0_1, %c0_2, %5] : memref<1x16x256xbf16, #tpu.memory_space<vmem>>, vector<1x16x256xbf16>
    %7 = vector.shape_cast %6 : vector<1x16x256xbf16> to vector<16x256xbf16>
    %8 = vector.extract_strided_slice %7 {offsets = [0, 0], sizes = [16, 128], strides = [1, 1]} : vector<16x256xbf16> to vector<16x128xbf16>
    %9 = vector.extract_strided_slice %4 {offsets = [0, 1], sizes = [16, 128], strides = [1, 1]} : vector<16x256xbf16> to vector<16x128xbf16>
    %10 = vector.extract_strided_slice %7 {offsets = [0, 1], sizes = [16, 128], strides = [1, 1]} : vector<16x256xbf16> to vector<16x128xbf16>
    %11 = tpu.concatenate %8, %9, %10 in 0 : vector<16x128xbf16>, vector<16x128xbf16>, vector<16x128xbf16> -> vector<48x128xbf16>
    %c0_3 = arith.constant 0 : index
    %c0_4 = arith.constant 0 : index
    %12 = vector.load %arg4[%c0_3, %c0_4] : memref<32x48xbf16, #tpu.memory_space<vmem>>, vector<32x48xbf16>
    %cst = arith.constant dense<0.000000e+00> : vector<32x128xf32>
    %13 = tpu.matmul %12, %11, %cst {dimension_numbers = #tpu.dot_dimension_numbers<[1], [0], [0], [1], [0, 0, 1, 1], [], []>} : vector<32x48xbf16>, vector<48x128xbf16>, vector<32x128xf32> -> vector<32x128xf32>
    %c0_5 = arith.constant 0 : index
    %c0_6 = arith.constant 0 : index
    %14 = vector.load %arg5[%c0_5, %c0_6] : memref<32x1xf32, #tpu.memory_space<vmem>>, vector<32x1xf32>
    %15 = vector.broadcast %14 : vector<32x1xf32> to vector<32x128xf32>
    %16 = arith.addf %13, %15 : vector<32x128xf32>
    %17 = vector.extract_strided_slice %16 {offsets = [0, 0], sizes = [16, 128], strides = [1, 1]} : vector<32x128xf32> to vector<16x128xf32>
    %18 = vector.extract_strided_slice %16 {offsets = [16, 0], sizes = [16, 128], strides = [1, 1]} : vector<32x128xf32> to vector<16x128xf32>
    %19 = arith.negf %18 : vector<16x128xf32>
    %20 = math.exp %19 : vector<16x128xf32>
    %cst_7 = arith.constant 1.000000e+00 : f32
    %21 = vector.broadcast %cst_7 : f32 to vector<16x128xf32>
    %22 = arith.addf %21, %20 : vector<16x128xf32>
    %23 = arith.divf %21, %22 : vector<16x128xf32>
    %24 = arith.mulf %17, %23 : vector<16x128xf32>
    %25 = arith.truncf %24 : vector<16x128xf32> to vector<16x128xbf16>
    %c0_8 = arith.constant 0 : index
    %c0_9 = arith.constant 0 : index
    %c0_10 = arith.constant 0 : index
    %26 = vector.load %arg6[%c0_8, %c0_9, %c0_10] : memref<1x16x128xbf16, #tpu.memory_space<vmem>>, vector<1x16x128xbf16>
    %27 = vector.shape_cast %26 : vector<1x16x128xbf16> to vector<16x128xbf16>
    %28 = vector.shape_cast %25 : vector<16x128xbf16> to vector<1x16x128xbf16>
    tpu.vector_store %arg6[%c0_8, %c0_9, %c0_10], %28 {strides = array<i32>} : memref<1x16x128xbf16, #tpu.memory_space<vmem>>, vector<1x16x128xbf16>,
    return
  }
  func.func @transform_0(%arg0: i32, %arg1: i32) -> (i32, i32, i32) {
    %c0_i32 = arith.constant 0 : i32
    %c0_i32_0 = arith.constant 0 : i32
    %c0_i32_1 = arith.constant 0 : i32
    return %arg0, %c0_i32, %c0_i32_0 : i32, i32, i32
  }
  func.func @transform_1(%arg0: i32, %arg1: i32) -> (i32, i32, i32) {
    %c0_i32 = arith.constant 0 : i32
    %c0_i32_0 = arith.constant 0 : i32
    %c0_i32_1 = arith.constant 0 : i32
    return %arg0, %c0_i32, %c0_i32_0 : i32, i32, i32
  }
  func.func @transform_2(%arg0: i32, %arg1: i32) -> (i32, i32) {
    %c0_i32 = arith.constant 0 : i32
    %c0_i32_0 = arith.constant 0 : i32
    %c0_i32_1 = arith.constant 0 : i32
    return %c0_i32, %c0_i32_0 : i32, i32
  }
  func.func @transform_3(%arg0: i32, %arg1: i32) -> (i32, i32) {
    %c0_i32 = arith.constant 0 : i32
    %c0_i32_0 = arith.constant 0 : i32
    %c0_i32_1 = arith.constant 0 : i32
    return %c0_i32, %c0_i32_0 : i32, i32
  }
  func.func @transform_4(%arg0: i32, %arg1: i32) -> (i32, i32, i32) {
    %c0_i32 = arith.constant 0 : i32
    %c0_i32_0 = arith.constant 0 : i32
    return %arg0, %c0_i32, %arg1 : i32, i32, i32
  }
}

</mosaic_0001>

<bundles_post_ra>
// kernel: tpu_custom_call.1
= control target key start
LH: loop header
LB: loop body
LE: loop exit
PB: predicated region body
PF: predicated region fallthrough
CT: control target
= control target key end

     0   :  { %9 = vsyncpa [#allocation3], 0  ;;  %s1125_s0 = inlined_call_operand.vmem [shape: bf16[2,16,256], index: 0, kind: input, shape index: {}]   ;;  %s1126_s1 = inlined_call_operand.hbm [shape: bf16[2,16,256], index: 1, kind: input, shape index: {}]   ;;  %s1127_s2 = inlined_call_operand.hbm [shape: bf16[32,48], index: 2, kind: input, shape index: {}]   ;;  %s1128_s3 = inlined_call_operand.vmem [shape: f32[32,1], index: 3, kind: input, shape index: {}]   ;;  %s1129_s4 = inlined_call_operand.hbm [shape: bf16[2,16,128], index: 4, kind: output, shape index: {}]  }
   0x1   :  { %11 = vsyncpa [#allocation3 + $0x1], 0 }
   0x2   :  { %12 = vsyncpa [#allocation6], 0 }
   0x3   :  { %13 = vsyncpa [#allocation4], 0 }
   0x4   :  { %15 = vsyncpa [#allocation4 + $0x1], 0  ;;  %s886_s15 = smov 0   ;;  %s888_s16 = smov 0  }
   0x5   :  { %s890_s17 = smov 0   ;;  %s892_s18 = smov 0  }
   0x6   :  { %s894_s19 = smov 0   ;;  %s896_s20 = smov 0  }
   0x7 LB: > { %s549_s21 = sadd.s32 4294967295, %s848_s20   ;;  %s550_s22 = sadd.s32 4294967294, %s848_s20   ;;  %s848_s20 = sphi %s896_s20, %s21_s20   ;;  %s844_s19 = sphi %s894_s19, %s1153_s19   ;;  %s840_s18 = sphi %s892_s18, %s1152_s18   ;;  %s836_s17 = sphi %s890_s17, %s1151_s17   ;;  %s832_s16 = sphi %s888_s16, %s1150_s16   ;;  %s828_s15 = sphi %s886_s15, %s1149_s15  }
   0x8   : > { %p79_p0 = scmp.ne.s32.totalorder %s832_s16, %s828_s15  ;;  %p920_p1 = scmp.eq.s32.totalorder %s549_s21, 0 }
   0x9   : > { %p924_p2 = scmp.eq.s32.totalorder %s549_s21, 1  ;;  %p153_p3 = scmp.eq.s32.totalorder %s550_s22, 1 }
   0xa   : > { %s1134_s23 = scalar_select %p920_p1, 1, 0 }
   0xb   : > { %s1135_s24 = scalar_select %p924_p2, 1, 0 }
   0xc   : > { %p930_p4 = por %p920_p1, %p79_p0  ;;  %p551_p5 = scmp.ge.s32.totalorder %s848_s20, 1 }
   0xd   : > { %p935_p6 = por %p153_p3, %p79_p0  ;;  %p160_p7 = scmp.lt.s32.totalorder %s848_s20, 3 }
   0xe   : > { %s1136_s25 = scalar_select %p930_p4, 1, 0 }
   0xf   : > { %s1137_s26 = scalar_select %p935_p6, 1, 0 }
  0x10   : > { %p940_p8 = pnand %p551_p5, %p160_p7  ;;  %s850_s28 = smov [#allocation5]  }
  0x11   : > { %s172_s29 = sshll.u32 %s850_s28, 4  ;;  %s33_s5 = sadd.s32 1, %s844_s19  ;;  %s173_s29 = int_to_ptr.vmem [resolvable:$true] %s172_s29 }
  0x12   : > { %s1138_s27 = scalar_select %p940_p8, 1, 0 }
  0x13   : > { %p613_p9 = pneg %p940_p8  ;;  %s704_s8 = scalar_lea.hbm %s1127_s2, 256 }
  0x14   : > { %p705_p12 = scmp.ne.s32.totalorder %s1127_s2, %s704_s8  ;;  %p711_p5 = scmp.lt.u32.totalorder %s704_s8, %s1127_s2 }
  0x15   : > { %p949_p11 = pnand %p613_p9, %p920_p1 }
  0x17   : > { %p706_p13 = pneg %p949_p11 }
  0x19   : > { %p707_p0 = pnand %p706_p13, %p705_p12 }
  0x1b   : > { %p708_p3 = pneg %p707_p0 }
  0x1d   : > { %p713_p7 = pnand %p711_p5, %p708_p3 }
  0x1f   : > { %716 = shalt.err (!%p713_p7)
}
  0x20   : > { %s717_s13 = scalar_lea.vmem %s173_s29, 256  ;;  %p725_p1 = scmp.lt.s32.totalorder %s173_s29, %s173_s29 }
  0x21   : > { %p718_p9 = scmp.ne.s32.totalorder %s173_s29, %s717_s13  ;;  %p726_p4 = scmp.lt.s32.totalorder %s717_s13, %s717_s13 }
  0x23   : > { %p720_p10 = pnand %p718_p9, %p706_p13  ;;  %p727_p8 = por %p726_p4, %p725_p1 }
  0x25   : > { %p721_p6 = pneg %p720_p10 }
  0x27   : > { %p728_p2 = pnand %p727_p8, %p721_p6 }
  0x29   : > { %731 = shalt.err (!%p728_p2)
}
  0x2a   : > { %s851_s14 = smov 64   ;;  %s852_s21 = smov 4  }
  0x2b   : > { %616 = dma.hbm_to_vmem [thread:$0]  (!%p949_p11), %s1127_s2, 256, %s173_s29, [#allocation6], %s851_s14, %s851_s14, %s852_s21  }
  0x2c   : > { %p35_p1 = scmp.ge.s32.totalorder %s33_s5, 2  ;;  %s66_s6 = sadd.s32 1, %s836_s17 }
  0x2d   : > { %p73_p2 = scmp.ne.s32.totalorder %s836_s17, %s832_s16  ;;  %p74_p4 = scmp.eq.s32.totalorder %s848_s20, 0 }
  0x2e   : > { %s1155_s5 = smov (%p35_p1, %s33_s5), 0  ;;  %p1141_p8 = scmp.ne.s32.totalorder %s1135_s24, 0 }
  0x2f   : > { %p976_p6 = por %p74_p4, %p73_p2  ;;  %s63_s30 = ssub.s32 %s844_s19, %s1155_s5 }
  0x30   : > { %p982_p10 = por %p1141_p8, %p73_p2  ;;  %p626_p12 = scmp.lt.s32.totalorder %s848_s20, 2 }
  0x31   : > { %p64_p11 = scmp.eq.s32.totalorder %s63_s30, 0  ;;  %s197_s29 = sand.u32 1, %s836_s17  }
  0x32   : > { %s554_s9 = sshll.u32 %s197_s29, 4  ;;  %s580_s11 = sshll.u32 %s844_s19, 8 }
  0x33   : > { %s991_s10 = scalar_select %p64_p11, %s836_s17, %s66_s6  }
  0x34   : > { %s997_s14 = scalar_lea.hbm %s1126_s1, %s580_s11  ;;  %s201_s24 = scalar_lea.vmem [#allocation2], %s554_s9 }
  0x35   : > { %s208_s21 = sshll.u32 %s201_s24, 4  ;;  %p1003_p13 = pnand %p626_p12, %p976_p6  ;;  %s999_s21 = int_to_ptr.vmem [resolvable:$true] %s208_s21 }
  0x36   : > { %s1007_s28 = scalar_lea.sflag [#allocation3], %s197_s29  ;;  %s732_s6 = scalar_lea.hbm %s997_s14, 256 }
  0x37   : > { %p733_p0 = scmp.ne.s32.totalorder %s997_s14, %s732_s6  ;;  %p734_p3 = pneg %p1003_p13 }
  0x38   : > { %s737_s7 = scalar_lea.hbm %s1126_s1, 512  ;;  %p738_p9 = scmp.lt.u32.totalorder %s997_s14, %s1126_s1 }
  0x39   : > { %p735_p5 = pnand %p734_p3, %p733_p0  ;;  %p739_p1 = scmp.lt.u32.totalorder %s737_s7, %s732_s6 }
  0x3a   : > { %p741_p4 = scmp.lt.u32.totalorder %s732_s6, %s997_s14 }
  0x3b   : > { %p736_p7 = pneg %p735_p5  ;;  %p740_p2 = por %p739_p1, %p738_p9 }
  0x3d   : > { %p742_p6 = por %p741_p4, %p740_p2 }
  0x3f   : > { %p743_p8 = pnand %p742_p6, %p736_p7 }
  0x41   : > { %746 = shalt.err (!%p743_p8)
}
  0x42   : > { %s747_s29 = scalar_lea.vmem %s999_s21, 256  ;;  %s853_s13 = smov [#allocation2]  }
  0x43   : > { %p748_p12 = scmp.ne.s32.totalorder %s999_s21, %s747_s29  ;;  %s752_s24 = sshll.u32 %s853_s13, 4  ;;  %s753_s24 = int_to_ptr.vmem [resolvable:$false] %s752_s24 }
  0x44   : > { %s754_s30 = scalar_lea.vmem %s753_s24, 512  ;;  %p755_p5 = scmp.lt.s32.totalorder %s999_s21, %s753_s24 }
  0x45   : > { %p750_p11 = pnand %p748_p12, %p734_p3  ;;  %p756_p9 = scmp.lt.s32.totalorder %s754_s30, %s747_s29 }
  0x47   : > { %p751_p0 = pneg %p750_p11  ;;  %p757_p1 = por %p756_p9, %p755_p5 }
  0x49   : > { %p758_p2 = pnand %p757_p1, %p751_p0 }
  0x4b   : > { %761 = shalt.err (!%p758_p2)
}
  0x4c   : > { %s854_s6 = smov 128   ;;  %s855_s9 = smov 8  }
  0x4d   : > { %620 = dma.hbm_to_vmem [thread:$0]  (!%p1003_p13), %s997_s14, 256, %s999_s21, %s1007_s28, %s854_s6, %s854_s6, %s855_s9  }
  0x4e   : > { %p1144_p3 = scmp.ne.s32.totalorder %s1138_s27, 0 }
  0x4f   : > { %s1038_s7 = sand.u32 (!%p1144_p3), 1, %s832_s16   ;;  %p1145_p7 = scmp.ne.s32.totalorder (!%p1144_p3), %s1136_s25, 0 }
  0x50   : > { %220 = sbr.rel (%p1144_p3) target bundleno = 487 (0x1e7), region = 36  ;;  %s558_s11 = sshll.u32 (!%p1144_p3), %s1038_s7, 4 }
  0x51   : > { %s223_s12 = scalar_lea.sflag (!%p1144_p3), [#allocation3], %s1038_s7  ;;  %s226_s29 = scalar_lea.vmem (!%p1144_p3), [#allocation2], %s558_s11 }
  0x57   : > { %815 = dma.done.wait (%p1145_p7), %s223_s12, 256  }
  0x58   : > { %817 = vsyncadd (%p1145_p7), %s223_s12, 4294967040  ;;  %p1146_p4 = scmp.ne.s32.totalorder %s1134_s23, 0 }
  0x5a   : > { %819 = dma.done.wait (%p1146_p4), [#allocation6], 256  }
  0x5b   : > { %821 = vsyncadd (%p1146_p4), [#allocation6], 4294967040  ;;  %p260_p13 = scmp.lt.s32.totalorder %s840_s18, 1  ;;  %v688_v0 = vld [vmem:[%s226_s29] ss:$8 sps:$4 sm:$0xff]   ;;  %vm345_vm0 = vcmask 392192  }
  0x5c   : > { %s856_s25 = smov 127   ;;  %v693_v3 = vld [vmem:[%s226_s29 + $0x4] ss:$8 sps:$4 sm:$0xff]   ;;  %595 = vmatprep.subr.bf16.mxu0 %v688_v0  ;;  %v857_v5 = vmov 0   ;;  %vm295_vm1 = vcmask 1039360   ;;  %s560_s29 = sshll.u32 %s1038_s7, 3 }
  0x5d   : > { %s261_s27 = scalar_select %p260_p13, %s840_s18, 1  ;;  %301 = vrot.lane.b32.xlu1 %v688_v0, %s856_s25  ;;  %596 = vmatpush3.bf16.msra.mxu0 %v688_v0  ;;  %v694_v4 = vld [vmem:[#allocation5] sm:$0xff]   ;;  %v314_v6 = vld [vmem:[%s1128_s3 + $0x18] sm:$0xff]  ;;  %v313_v7 = vld [vmem:[%s1128_s3 + $0x10] sm:$0xff] }
  0x5e   : > { %687 = vset.pattern.permute.xlu1 %v857_v5  ;;  %686 = vset.pattern.permute.xlu0 %v857_v5  ;;  %v311_v8 = vld [vmem:[%s1128_s3] sm:$0xff]  ;;  %v312_v9 = vld [vmem:[%s1128_s3 + $0x8] sm:$0xff]  ;;  %s426_s23 = scalar_lea.sflag [#allocation4], %s1038_s7 }
  0x5f   : > { %s581_s14 = sshll.u32 %s261_s27, 4  ;;  %601 = vmatprep.mubr.msk.bf16.mxu0 %vm345_vm0, %v694_v4  ;;  %v695_v16 = vld [vmem:[#allocation5 + $0x8] sm:$0xff]   ;;  %s584_s27 = sshll.u32 %s840_s18, 7 }
  0x60   : > { %s264_s28 = scalar_lea.vmem %s1125_s0, %s581_s14  ;;  %s259_s14 = scalar_lea.vmem [#allocation7], %s560_s29 }
  0x61   : > { %v690_v1 = vld [vmem:[%s264_s28] ss:$8 sps:$4 sm:$0xff]   ;;  %v692_v2 = vld [vmem:[%s264_s28 + $0x4] ss:$8 sps:$4 sm:$0xff]   ;;  %303 = vrot.lane.b32.xlu1 %v693_v3, %s856_s25  ;;  %s440_s21 = sshll.u32 %s259_s14, 4  ;;  %s858_s18 = smov [#allocation7]   ;;  %s1076_s21 = int_to_ptr.vmem [resolvable:$true] %s440_s21 }
  0x62   : > { %291 = vrot.lane.b32.xlu0 %v690_v1, %s856_s25  ;;  %s762_s13 = scalar_lea.vmem %s1076_s21, 128  ;;  %s766_s24 = sshll.u32 %s858_s18, 4  ;;  %s767_s24 = int_to_ptr.vmem [resolvable:$false] %s766_s24 }
  0x63   : > { %p763_p6 = scmp.ne.s32.totalorder %s1076_s21, %s762_s13  ;;  %s768_s30 = scalar_lea.vmem %s767_s24, 256 }
  0x64   : > { %p769_p11 = scmp.lt.s32.totalorder %s1076_s21, %s767_s24  ;;  %p770_p0 = scmp.lt.s32.totalorder %s768_s30, %s762_s13 }
  0x65   : > { %332 = vperm.xlu1 %687, %v314_v6   ;;  %p764_p8 = pnand %p763_p6, %p982_p10 }
  0x66   : > { %293 = vrot.lane.b32.xlu0 %v692_v2, %s856_s25  ;;  %s1074_s25 = scalar_lea.hbm %s1129_s4, %s584_s27  ;;  %p771_p5 = por %p770_p0, %p769_p11 }
  0x67   : > { %p765_p12 = pneg %p764_p8 }
  0x69   : > { %317 = vperm.xlu1 %687, %v311_v8   ;;  %p772_p9 = pnand %p771_p5, %p765_p12 }
  0x6a   : > { %327 = vperm.xlu0 %686, %v313_v7  }
  0x6e   : > { %322 = vperm.xlu0 %686, %v312_v9  }
  0xcf   : > { %v302_v10 = vpop.permute.xlu1 %301 }
  0xd3   : > { %v304_v12 = vpop.permute.xlu1 %303 }
  0xd4   : > { %v292_v11 = vpop.permute.xlu0 %291  ;;  %v305_v15 = vsel %vm295_vm1, %v302_v10, %v304_v12 }
  0xd8   : > { %v294_v13 = vpop.permute.xlu0 %293 }
  0xd9   : > { %v296_v14 = vsel %vm295_vm1, %v292_v11, %v294_v13 }
  0xda   : > { %597 = vmatprep.subr.bf16.mxu0 %v296_v14 }
  0xdb   : > { %598 = vmatpush3.bf16.msra.mxu0 %v296_v14 }
  0xdc   : > { %599 = vmatprep.subr.bf16.mxu0 %v305_v15 }
  0xdf   : > { %600 = vmatpush3.bf16.msra.mxu0 %v305_v15 }
  0xe2   : > { %602 = vmatmul.mubr.msk.bf16.vlgmr.msra.gmra.mrb[0].mxu0 %vm345_vm0, %v695_v16 }
  0xe4   : > { %v333_v21 = vpop.permute.xlu1 %332 }
  0xe8   : > { %v318_v31 = vpop.permute.xlu1 %317 }
  0xe9   : > { %v328_v17 = vpop.permute.xlu0 %327 }
  0xed   : > { %v323_v32 = vpop.permute.xlu0 %322 }
 0x1b5   : > { %v603_v18 = vpop.f32.mrb[0].mxu0 }
 0x1b6   : > { %v395_v19 = vadd.f32 %v603_v18, %v328_v17  ;;  %v386_v20 = vpop.f32.mrb[1].mxu0 }
 0x1b7   : > { %v604_v22 = vpop.f32.mrb[2].mxu0  ;;  %v387_v33 = vadd.f32 %v386_v20, %v318_v31 }
 0x1b8   : > { %v571_v23 = vmul.f32 -1.442695, %v395_v19  ;;  %v398_v24 = vadd.f32 %v604_v22, %v333_v21  ;;  %v389_v25 = vpop.f32.mrb[3].mxu0 }
 0x1b9   : > { %v390_v36 = vadd.f32 %v389_v25, %v323_v32 }
 0x1ba   : > { %696 = vpow2.f32 %v571_v23  ;;  %v572_v26 = vmul.f32 -1.442695, %v398_v24 }
 0x1bc   : > { %698 = vpow2.f32 %v572_v26 }
 0x1c4   : > { %v697_v27 = vpop.eup %696 }
 0x1c5   : > { %v407_v28 = vadd.f32 1.0, %v697_v27 }
 0x1c6   : > { %v699_v29 = vpop.eup %698 }
 0x1c7   : > { %700 = vrcp.f32 %v407_v28  ;;  %v408_v30 = vadd.f32 1.0, %v699_v29 }
 0x1c9   : > { %702 = vrcp.f32 %v408_v30 }
 0x1d1   : > { %v701_v34 = vpop.eup %700 }
 0x1d2   : > { %v413_v35 = vmul.f32 %v701_v34, %v387_v33 }
 0x1d3   : > { %v703_v37 = vpop.eup %702 }
 0x1d4   : > { %v414_v38 = vmul.f32 %v703_v37, %v390_v36 }
 0x1d6   : > { %v588_v39 = vpack.c.bf16 %v414_v38, %v413_v35 }
 0x1d8   : > { %589 = vst [vmem:[%s259_s14] sm:$0xff] %v588_v39  }
 0x1d9   : > { %775 = shalt.err (!%p772_p9)
}
 0x1da   : > { %s776_s6 = scalar_lea.hbm %s1074_s25, 128  ;;  %s780_s12 = scalar_lea.hbm %s1129_s4, 256 }
 0x1db   : > { %p777_p1 = scmp.ne.s32.totalorder %s1074_s25, %s776_s6  ;;  %p781_p7 = scmp.lt.u32.totalorder %s1074_s25, %s1129_s4 }
 0x1dc   : > { %p782_p4 = scmp.lt.u32.totalorder %s780_s12, %s776_s6  ;;  %p784_p6 = scmp.lt.u32.totalorder %s776_s6, %s1074_s25 }
 0x1dd   : > { %p778_p2 = pnand %p777_p1, %p982_p10 }
 0x1de   : > { %p783_p13 = por %p782_p4, %p781_p7 }
 0x1df   : > { %p779_p3 = pneg %p778_p2 }
 0x1e0   : > { %p785_p8 = por %p784_p6, %p783_p13 }
 0x1e2   : > { %p786_p12 = pnand %p785_p8, %p779_p3 }
 0x1e4   : > { %789 = shalt.err (!%p786_p12)
}
 0x1e5   : > { %s859_s14 = smov 64   ;;  %s860_s22 = smov 4  }
 0x1e6   : > { %611 = dma.vmem_to_hbm [thread:$0]  (%p982_p10), %s1076_s21, 128, %s1074_s25, %s426_s23, %s859_s14, %s859_s14, %s860_s22  }
 0x1e7 PF: > { %s455_s28 = sand.u32 1, %s828_s15   ;;  %p1147_p11 = scmp.ne.s32.totalorder %s1137_s26, 0 }
 0x1e8   : > { %p1148_p0 = scmp.ge.s32.totalorder %s848_s20, 2  ;;  %s456_s13 = scalar_lea.sflag [#allocation4], %s455_s28 }
 0x1ea   : > { %p622_p5 = pnand %p1148_p0, %p1147_p11 }
 0x1ec   : > { %823 = dma.done.wait (!%p622_p5), %s456_s13, 128  }
 0x1ed   : > { %825 = vsyncadd (!%p622_p5), %s456_s13, 4294967168  ;;  %s21_s20 = sadd.s32 1, %s848_s20   ;;  %s1149_s15 = smov %s832_s16 }
 0x1ee   : > { %p18_p9 = scmp.ge.s32.totalorder %s21_s20, 4   ;;  %s1150_s16 = smov %s836_s17 }
 0x1ef   : > { %s1151_s17 = smov %s991_s10  ;;  %s1152_s18 = smov %s844_s19 }
 0x1f0   : > { %s1153_s19 = smov %s1155_s5  ;;  %20 = sbr.rel (!%p18_p9) target bundleno = 7 (0x7), region = 90 }
 0x1f7   :  { %461 = vsyncpa [#allocation3], 1 }
 0x1f8   :  { %463 = vsyncpa [#allocation3 + $0x1], 1 }
 0x1f9   :  { %464 = vsyncpa [#allocation6], 1 }
 0x1fa   :  { %465 = vsyncpa [#allocation4], 1 }
 0x1fb   :  { %467 = vsyncpa [#allocation4 + $0x1], 1 }

</bundles_post_ra>
